<compile_context>
chip_gen: v7x
topology: tpu7x:2x2x1
jax: 0.10.0
libtpu: 0.0.40
codegen_flags: <defaults>
</compile_context>

<pallas_src>
import jax
import jax.numpy as jnp
from jax.experimental import pallas as pl
from jax.experimental.pallas import tpu as pltpu  # noqa: F401  (TPU backend assumed)


def _round_up(n, m):
    return -(-n // m) * m


# ----------------------------------------------------------------------------
# Pallas kernel: whole batch in one invocation, everything as MXU matmuls.
#   refs: x (B, DIM), M_stack (num_layers, DIM, DIM), shift_stack (num_layers, 1, DIM),
#         Wbf (DIM, BF)  ->  h_out (B, DIM), bf_out (B, BF)
# ----------------------------------------------------------------------------
def make_trend_kernel(num_layers):
    def kernel(x_ref, m_ref, shift_ref, wbf_ref, h_ref, bf_ref):
        h = x_ref[...]                                           # (B, DIM) f32
        for i in range(num_layers):                              # static unroll
            z = jnp.dot(h, m_ref[i], preferred_element_type=jnp.float32)
            h = jnp.maximum(z + shift_ref[i], 0.0)               # conv+BN+bias+ReLU
        h_ref[...] = h                                           # lane-dense (B, DIM)
        # backcast|forecast in one matmul against precomposed, column-padded basis.
        bf_ref[...] = jnp.dot(h, wbf_ref[...],
                              preferred_element_type=jnp.float32)  # lane-dense (B, BF)

    return kernel


# ----------------------------------------------------------------------------
# One-time weight packing (plain JAX, done once per weight set).
# ----------------------------------------------------------------------------
def pack_trend_params(layer_params, W3, Tb, Tf, L):
    num_layers = len(layer_params)
    K = layer_params[0][0].shape[0]
    pad = (K - 1) // 2                       # 'same' for odd K (padding=1, K=3)
    p, C1, _ = W3.shape
    assert p <= 4, "thetas_dim is too big."
    C0 = layer_params[0][0].shape[2]
    assert C0 <= C1, "layer-0 input channels must not exceed hidden channels"
    Lb, Lf = Tb.shape[1], Tf.shape[1]
    DIM = C1 * L                             # 128 for the test shapes
    BF = _round_up(Lb + Lf, 128)             # lane-dense merged output width

    # Conv1d('same') as one banded matrix per layer, with BN scale folded into its
    # columns and bias merged into the per-column shift:
    #   M[c*L + l', o*L + l] = sum_k w[k,o,c] * [l' == l + k - pad] * scale[o]
    #   shift'[o*L + l]      = bias[o] * scale[o] + shift[o]
    def conv_band_matrix(w):                 # w: (K, C_out, C_in)
        M = jnp.zeros((w.shape[2] * L, w.shape[1] * L), jnp.float32)
        for tap in range(K):
            S = jnp.eye(L, L, k=-(tap - pad), dtype=jnp.float32)   # l' == l + tap - pad
            M = M + jnp.kron(w[tap].T, S)    # (Cin,Cout) kron (L,L) -> (Cin*L, Cout*L)
        return M

    def per_channel_row(v):                  # (C,1) -> (1, C*L)
        return jnp.repeat(v.reshape(-1), L)[None, :].astype(jnp.float32)

    m_list, shift_list = [], []
    for (w, bias, sc, sh) in layer_params:
        sc_row = per_channel_row(sc)                          # (1, C1*L)
        M = conv_band_matrix(w) * sc_row                      # scale folded into columns
        shift_row = per_channel_row(bias) * sc_row + per_channel_row(sh)
        if M.shape[0] < DIM:                                  # pad layer-0 rows to DIM
            M = jnp.pad(M, ((0, DIM - M.shape[0]), (0, 0)))
        m_list.append(M)
        shift_list.append(shift_row)

    m_stack = jnp.stack(m_list)                               # (num_layers, DIM, DIM)
    shift_stack = jnp.stack(shift_list)                       # (num_layers, 1, DIM)

    # Precompose theta-linear with the trend basis:  Wbf = W2^T @ [Tb | Tf], pad to BF.
    W2T = W3.reshape(p, C1 * L).T.astype(jnp.float32)         # (C1*L, p)
    Tcat = jnp.concatenate([Tb, Tf], axis=1).astype(jnp.float32)   # (p, Lb+Lf)
    Wbf = W2T @ Tcat                                          # (C1*L, Lb+Lf)
    Wbf = jnp.pad(Wbf, ((0, 0), (0, BF - Wbf.shape[1])))      # (DIM, BF) lane-dense

    meta = dict(num_layers=num_layers, C1=C1, L=L, Lb=Lb, Lf=Lf, DIM=DIM, BF=BF)
    return (m_stack, shift_stack, Wbf), meta


# ----------------------------------------------------------------------------
# Jitted forward: only data plumbing + the single pallas_call.
# ----------------------------------------------------------------------------
def make_trend_forward(meta):
    num_layers = meta["num_layers"]
    C1, L, Lb, Lf = meta["C1"], meta["L"], meta["Lb"], meta["Lf"]
    DIM, BF = meta["DIM"], meta["BF"]
    kernel = make_trend_kernel(num_layers)

    @jax.jit
    def fwd(x, m_stack, shift_stack, wbf):
        B = x.shape[0]
        x2 = x.reshape(B, -1).astype(jnp.float32)             # (B, C0*L), flatten c*L+l
        if x2.shape[1] < DIM:
            x2 = jnp.pad(x2, ((0, 0), (0, DIM - x2.shape[1])))  # zero cols hit zero rows

        h2, bf = pl.pallas_call(
            kernel,
            out_shape=(jax.ShapeDtypeStruct((B, DIM), jnp.float32),
                       jax.ShapeDtypeStruct((B, BF), jnp.float32)),
        )(x2, m_stack, shift_stack, wbf)

        h = h2[:, :C1 * L].reshape(B, C1, L)
        return h, bf[:, :Lb], bf[:, Lb:Lb + Lf]

    return fwd


# ----------------------------------------------------------------------------
# Pure-JAX reference (for correctness check).
# ----------------------------------------------------------------------------
def reference_forward(x, layer_params, W3, Tb, Tf):
    h = x
    K = layer_params[0][0].shape[0]
    pad = (K - 1) // 2
    for (w, bias, sc, sh) in layer_params:
        B_, _, L = h.shape
        hp = jnp.pad(h, ((0, 0), (0, 0), (pad, pad)))
        acc = jnp.zeros((B_, w.shape[1], L), jnp.float32)
        for k in range(K):
            acc = acc + jnp.einsum('oc,bcl->bol', w[k], hp[:, :, k:k + L])
        h = jnp.maximum((acc + bias[None]) * sc[None] + sh[None], 0.0)
    B_ = h.shape[0]
    p = W3.shape[0]
    hf = h.reshape(B_, -1)
    W2 = W3.reshape(p, -1)
    theta = hf @ W2.T            # theta_b_fc == theta_f_fc (shared weight)
    return h, theta @ Tb, theta @ Tf


# ----------------------------------------------------------------------------
# Deterministic parameter construction + linear_space / trend basis.
# ----------------------------------------------------------------------------
def linear_space(backcast_length, forecast_length):
    ls = jnp.arange(-backcast_length, forecast_length, 1) / forecast_length
    b_ls = jnp.abs(jnp.flip(ls[:backcast_length]))
    f_ls = ls[backcast_length:]
    return b_ls, f_ls


def init_params(key, C0, C1, K, L, p, num_layers):
    eps = 1e-5
    layer_params = []
    for i in range(num_layers):
        c_in = C0 if i == 0 else C1
        key, kw, kb, kg, kbe, km, kv = jax.random.split(key, 7)
        w = jax.random.normal(kw, (K, C1, c_in), jnp.float32) / jnp.sqrt(c_in * K)
        bias = 0.1 * jax.random.normal(kb, (C1, 1), jnp.float32)
        gamma = jax.random.uniform(kg, (C1, 1), jnp.float32, 0.5, 1.5)
        beta = 0.1 * jax.random.normal(kbe, (C1, 1), jnp.float32)
        rmean = 0.1 * jax.random.normal(km, (C1, 1), jnp.float32)
        rvar = jax.random.uniform(kv, (C1, 1), jnp.float32, 0.5, 1.5)
        scale = gamma / jnp.sqrt(rvar + eps)          # eval-mode BN folded
        shift = beta - rmean * scale
        layer_params.append((w, bias, scale, shift))
    key, kl = jax.random.split(key)
    W2 = jax.random.normal(kl, (p, C1 * L), jnp.float32) / jnp.sqrt(C1 * L)
    W3 = W2.reshape(p, C1, L)                          # shared theta_b/theta_f weight
    return layer_params, W3


if __name__ == "__main__":
    # Small shapes consistent with the module's forward:
    #   backcast_length=16, forecast_length=8, kernels=3, channels=(4, 8),
    #   thetas_dim=3, num_layers_CNN=2, batch=2
    B, C0, C1 = 2, 4, 8
    backcast_length, forecast_length = 16, 8
    K, p, num_layers = 3, 3, 2

    key = jax.random.PRNGKey(0)
    key, kx = jax.random.split(key)
    x = jax.random.normal(kx, (B, C0, backcast_length), jnp.float32)

    layer_params, W3 = init_params(key, C0, C1, K, backcast_length, p, num_layers)

    b_ls, f_ls = linear_space(backcast_length, forecast_length)
    Tb = jnp.stack([b_ls ** i for i in range(p)]).astype(jnp.float32)  # (p, Lb)
    Tf = jnp.stack([f_ls ** i for i in range(p)]).astype(jnp.float32)  # (p, Lf)

    # One-time weight packing + jitted forward.
    (m_stack, shift_stack, wbf), meta = pack_trend_params(
        layer_params, W3, Tb, Tf, backcast_length)
    fwd = make_trend_forward(meta)

    h, backcast, forecast = fwd(x, m_stack, shift_stack, wbf)
    jax.block_until_ready((h, backcast, forecast))

    h_ref, back_ref, fore_ref = reference_forward(x, layer_params, W3, Tb, Tf)
    assert h.shape == (B, C1, backcast_length)
    assert backcast.shape == (B, backcast_length)
    assert forecast.shape == (B, forecast_length)
    assert jnp.allclose(h, h_ref, rtol=1e-4, atol=1e-4)
    assert jnp.allclose(backcast, back_ref, rtol=1e-4, atol=1e-4)
    assert jnp.allclose(forecast, fore_ref, rtol=1e-4, atol=1e-4)

    print("KERNEL_OK")
</pallas_src>

<mosaic_0001>
module attributes {stable_mosaic.version = 11 : i64} {
  func.func @kernel(%arg0: memref<2x128xf32, #tpu.memory_space<vmem>>, %arg1: memref<2x128x128xf32, #tpu.memory_space<vmem>>, %arg2: memref<2x1x128xf32, #tpu.memory_space<vmem>>, %arg3: memref<128x128xf32, #tpu.memory_space<vmem>>, %arg4: memref<2x128xf32, #tpu.memory_space<vmem>>, %arg5: memref<2x128xf32, #tpu.memory_space<vmem>>) attributes {dimension_semantics = [], scalar_prefetch = 0 : i64, scratch_operands = 0 : i64, tpu.core_type = #tpu.core_type<tc>} {
    %c0 = arith.constant 0 : index
    %c0_0 = arith.constant 0 : index
    %0 = vector.load %arg0[%c0, %c0_0] : memref<2x128xf32, #tpu.memory_space<vmem>>, vector<2x128xf32>
    %c0_1 = arith.constant 0 : index
    %c0_2 = arith.constant 0 : index
    %c0_3 = arith.constant 0 : index
    %1 = vector.load %arg1[%c0_1, %c0_2, %c0_3] : memref<2x128x128xf32, #tpu.memory_space<vmem>>, vector<1x128x128xf32>
    %2 = vector.shape_cast %1 : vector<1x128x128xf32> to vector<128x128xf32>
    %cst = arith.constant dense<0.000000e+00> : vector<2x128xf32>
    %3 = tpu.matmul %0, %2, %cst {dimension_numbers = #tpu.dot_dimension_numbers<[1], [0], [0], [1], [0, 0, 1, 1], [], []>} : vector<2x128xf32>, vector<128x128xf32>, vector<2x128xf32> -> vector<2x128xf32>
    %c0_4 = arith.constant 0 : index
    %c0_5 = arith.constant 0 : index
    %c0_6 = arith.constant 0 : index
    %4 = vector.load %arg2[%c0_4, %c0_5, %c0_6] : memref<2x1x128xf32, #tpu.memory_space<vmem>>, vector<1x1x128xf32>
    %5 = vector.shape_cast %4 : vector<1x1x128xf32> to vector<1x128xf32>
    %6 = vector.broadcast %5 : vector<1x128xf32> to vector<2x128xf32>
    %7 = arith.addf %3, %6 : vector<2x128xf32>
    %cst_7 = arith.constant 0.000000e+00 : f32
    %8 = vector.broadcast %cst_7 : f32 to vector<2x128xf32>
    %9 = arith.maximumf %7, %8 : vector<2x128xf32>
    %c1 = arith.constant 1 : index
    %c0_8 = arith.constant 0 : index
    %c0_9 = arith.constant 0 : index
    %10 = vector.load %arg1[%c1, %c0_8, %c0_9] : memref<2x128x128xf32, #tpu.memory_space<vmem>>, vector<1x128x128xf32>
    %11 = vector.shape_cast %10 : vector<1x128x128xf32> to vector<128x128xf32>
    %cst_10 = arith.constant dense<0.000000e+00> : vector<2x128xf32>
    %12 = tpu.matmul %9, %11, %cst_10 {dimension_numbers = #tpu.dot_dimension_numbers<[1], [0], [0], [1], [0, 0, 1, 1], [], []>} : vector<2x128xf32>, vector<128x128xf32>, vector<2x128xf32> -> vector<2x128xf32>
    %c1_11 = arith.constant 1 : index
    %c0_12 = arith.constant 0 : index
    %c0_13 = arith.constant 0 : index
    %13 = vector.load %arg2[%c1_11, %c0_12, %c0_13] : memref<2x1x128xf32, #tpu.memory_space<vmem>>, vector<1x1x128xf32>
    %14 = vector.shape_cast %13 : vector<1x1x128xf32> to vector<1x128xf32>
    %15 = vector.broadcast %14 : vector<1x128xf32> to vector<2x128xf32>
    %16 = arith.addf %12, %15 : vector<2x128xf32>
    %cst_14 = arith.constant 0.000000e+00 : f32
    %17 = vector.broadcast %cst_14 : f32 to vector<2x128xf32>
    %18 = arith.maximumf %16, %17 : vector<2x128xf32>
    %c0_15 = arith.constant 0 : index
    %c0_16 = arith.constant 0 : index
    %19 = vector.load %arg4[%c0_15, %c0_16] : memref<2x128xf32, #tpu.memory_space<vmem>>, vector<2x128xf32>
    tpu.vector_store %arg4[%c0_15, %c0_16], %18 {strides = array<i32>} : memref<2x128xf32, #tpu.memory_space<vmem>>, vector<2x128xf32>,
    %c0_17 = arith.constant 0 : index
    %c0_18 = arith.constant 0 : index
    %20 = vector.load %arg3[%c0_17, %c0_18] : memref<128x128xf32, #tpu.memory_space<vmem>>, vector<128x128xf32>
    %cst_19 = arith.constant dense<0.000000e+00> : vector<2x128xf32>
    %21 = tpu.matmul %18, %20, %cst_19 {dimension_numbers = #tpu.dot_dimension_numbers<[1], [0], [0], [1], [0, 0, 1, 1], [], []>} : vector<2x128xf32>, vector<128x128xf32>, vector<2x128xf32> -> vector<2x128xf32>
    %c0_20 = arith.constant 0 : index
    %c0_21 = arith.constant 0 : index
    %22 = vector.load %arg5[%c0_20, %c0_21] : memref<2x128xf32, #tpu.memory_space<vmem>>, vector<2x128xf32>
    tpu.vector_store %arg5[%c0_20, %c0_21], %21 {strides = array<i32>} : memref<2x128xf32, #tpu.memory_space<vmem>>, vector<2x128xf32>,
    return
  }
}

</mosaic_0001>

<bundles_post_ra>
// kernel: fwd.1
= control target key start
LH: loop header
LB: loop body
LE: loop exit
PB: predicated region body
PF: predicated region fallthrough
CT: control target
= control target key end

     0   :  { %11 = vsyncpa [#allocation3], 0  ;;  %s728_s0 = inlined_call_operand.vmem [shape: f32[2,128], index: 0, kind: input, shape index: {}]   ;;  %s729_s1 = inlined_call_operand.hbm [shape: f32[2,128,128], index: 1, kind: input, shape index: {}]   ;;  %s730_s2 = inlined_call_operand.vmem [shape: f32[2,1,128], index: 2, kind: input, shape index: {}]   ;;  %s731_s3 = inlined_call_operand.hbm [shape: f32[128,128], index: 3, kind: input, shape index: {}]   ;;  %s732_s4 = inlined_call_operand.vmem [shape: f32[2,128], index: 4, kind: output, shape index: {0}]   ;;  %s733_s5 = inlined_call_operand.vmem [shape: f32[2,128], index: 5, kind: output, shape index: {1}]  }
   0x1   :  { %12 = vsyncpa [#allocation5], 0  ;;  %s622_s18 = smov [#allocation2]   ;;  %s574_s22 = scalar_lea.hbm %s729_s1, 4096 }
   0x2   :  { %s20_s19 = sshll.u32 %s622_s18, 4  ;;  %p575_p0 = scmp.ne.s32.totalorder %s729_s1, %s574_s22  ;;  %s21_s19 = int_to_ptr.vmem [resolvable:$true] %s20_s19 }
   0x3   :  { %p578_p1 = scmp.lt.u32.totalorder %s574_s22, %s729_s1 }
   0x5   :  { %p580_p2 = pnand %p578_p1, %p575_p0 }
   0x7   :  { %583 = shalt.err (!%p580_p2)
}
   0x8   :  { %s584_s27 = scalar_lea.vmem %s21_s19, 4096  ;;  %p589_p4 = scmp.lt.s32.totalorder %s21_s19, %s21_s19 }
   0x9   :  { %p585_p3 = scmp.ne.s32.totalorder %s21_s19, %s584_s27  ;;  %p590_p5 = scmp.lt.s32.totalorder %s584_s27, %s584_s27 }
   0xb   :  { %p591_p6 = por %p590_p5, %p589_p4 }
   0xd   :  { %p592_p7 = pnand %p591_p6, %p585_p3 }
   0xf   :  { %595 = shalt.err (!%p592_p7)
}
  0x10   :  { %s623_s28 = smov 128   ;;  %s624_s29 = smov 8  }
  0x11   :  { %26 = dma.hbm_to_vmem [thread:$0]  %s729_s1, 4096, %s21_s19, [#allocation3], %s623_s28, %s623_s28, %s624_s29  }
  0x12   :  { %s625_s7 = smov [#allocation4]   ;;  %s596_s11 = scalar_lea.hbm %s731_s3, 2048 }
  0x13   :  { %s34_s8 = sshll.u32 %s625_s7, 4  ;;  %p597_p8 = scmp.ne.s32.totalorder %s731_s3, %s596_s11  ;;  %s35_s8 = int_to_ptr.vmem [resolvable:$true] %s34_s8 }
  0x14   :  { %p600_p9 = scmp.lt.u32.totalorder %s596_s11, %s731_s3 }
  0x16   :  { %p602_p10 = pnand %p600_p9, %p597_p8 }
  0x18   :  { %605 = shalt.err (!%p602_p10)
}
  0x19   :  { %s606_s16 = scalar_lea.vmem %s35_s8, 2048  ;;  %p611_p12 = scmp.lt.s32.totalorder %s35_s8, %s35_s8 }
  0x1a   :  { %p607_p11 = scmp.ne.s32.totalorder %s35_s8, %s606_s16  ;;  %p612_p13 = scmp.lt.s32.totalorder %s606_s16, %s606_s16 }
  0x1c   :  { %p613_p0 = por %p612_p13, %p611_p12 }
  0x1e   :  { %p614_p1 = pnand %p613_p0, %p607_p11 }
  0x20   :  { %617 = shalt.err (!%p614_p1)
}
  0x21   :  { %40 = dma.hbm_to_vmem [thread:$0]  %s731_s3, 2048, %s35_s8, [#allocation5], %s623_s28, %s623_s28, %s624_s29  }
  0x22   :  { %618 = dma.done.wait [#allocation3], 4096  }
  0x23   :  { %619 = vsyncadd [#allocation3], 4294963200 }
  0x24   :  { %620 = dma.done.wait [#allocation5], 2048  }
  0x25   :  { %621 = vsyncadd [#allocation5], 4294965248  ;;  %v626_v0 = vmov 0.0|0.0   ;;  %vm627_vm0 = vmmov 0   ;;  %v628_v1 = vmov 0.0   ;;  %v48_v2 = vld [vmem:[#allocation2] sm:$0xff] }
  0x26   :  { %495 = vmatprep.subr.bf16.mxu0 %v626_v0  ;;  %422 = vmatprep.mubr.msk.f32.mxu0 %vm627_vm0, %v628_v1  ;;  %v49_v3 = vld [vmem:[#allocation2 + $0x8] sm:$0xff]  ;;  %v50_v4 = vld [vmem:[#allocation2 + $0x10] sm:$0xff]  ;;  %v51_v6 = vld [vmem:[#allocation2 + $0x18] sm:$0xff] }
  0x27   :  { %519 = vmatprep.subr.bf16.mxu1 %v626_v0  ;;  %457 = vmatprep.mubr.msk.f32.mxu1 %vm627_vm0, %v628_v1  ;;  %v496_v5 = vpack.c.bf16 %v49_v3, %v48_v2  ;;  %v499_v7 = vpack.c.bf16 %v51_v6, %v50_v4  ;;  %v52_v8 = vld [vmem:[#allocation2 + $0x20] sm:$0xff]  ;;  %v53_v9 = vld [vmem:[#allocation2 + $0x28] sm:$0xff]  ;;  %v145_v12 = vld [vmem:[#allocation2 + $0x90] sm:$0xff] }
  0x28   :  { %v143_v10 = vld [vmem:[#allocation2 + $0x80] sm:$0xff]  ;;  %v144_v11 = vld [vmem:[#allocation2 + $0x88] sm:$0xff]  ;;  %v146_v13 = vld [vmem:[#allocation2 + $0x98] sm:$0xff]  ;;  %v502_v14 = vpack.c.bf16 %v53_v9, %v52_v8 }
  0x29   :  { %497 = vmatpush3.bf16.msra.mxu0 %v496_v5  ;;  %v520_v15 = vpack.c.bf16 %v144_v11, %v143_v10  ;;  %v54_v16 = vld [vmem:[#allocation2 + $0x30] sm:$0xff]  ;;  %v55_v17 = vld [vmem:[#allocation2 + $0x38] sm:$0xff]  ;;  %v523_v18 = vpack.c.bf16 %v146_v13, %v145_v12  ;;  %v147_v19 = vld [vmem:[#allocation2 + $0xa0] sm:$0xff] }
  0x2a   :  { %498 = vmatprep.subr.bf16.mxu0 %v626_v0  ;;  %v148_v20 = vld [vmem:[#allocation2 + $0xa8] sm:$0xff]  ;;  %v505_v21 = vpack.c.bf16 %v55_v17, %v54_v16  ;;  %v56_v22 = vld [vmem:[#allocation2 + $0x40] sm:$0xff]  ;;  %v149_v25 = vld [vmem:[#allocation2 + $0xb0] sm:$0xff] }
  0x2b   :  { %521 = vmatpush3.bf16.msra.mxu1 %v520_v15  ;;  %v57_v23 = vld [vmem:[#allocation2 + $0x48] sm:$0xff]  ;;  %v526_v24 = vpack.c.bf16 %v148_v20, %v147_v19  ;;  %v150_v26 = vld [vmem:[#allocation2 + $0xb8] sm:$0xff]  ;;  %v58_v28 = vld [vmem:[#allocation2 + $0x50] sm:$0xff] }
  0x2c   :  { %522 = vmatprep.subr.bf16.mxu1 %v626_v0  ;;  %v508_v27 = vpack.c.bf16 %v57_v23, %v56_v22  ;;  %v59_v29 = vld [vmem:[#allocation2 + $0x58] sm:$0xff]  ;;  %v529_v30 = vpack.c.bf16 %v150_v26, %v149_v25  ;;  %v151_v31 = vld [vmem:[#allocation2 + $0xc0] sm:$0xff]  ;;  %v152_v32 = vld [vmem:[#allocation2 + $0xc8] sm:$0xff] }
  0x2d   :  { %500 = vmatpush3.bf16.msra.mxu0 %v499_v7  ;;  %v511_v33 = vpack.c.bf16 %v59_v29, %v58_v28  ;;  %v60_v34 = vld [vmem:[#allocation2 + $0x60] sm:$0xff]  ;;  %v61_v35 = vld [vmem:[#allocation2 + $0x68] sm:$0xff]  ;;  %v532_v36 = vpack.c.bf16 %v152_v32, %v151_v31  ;;  %v153_v37 = vld [vmem:[#allocation2 + $0xd0] sm:$0xff] }
  0x2e   :  { %501 = vmatprep.subr.bf16.mxu0 %v626_v0  ;;  %v154_v38 = vld [vmem:[#allocation2 + $0xd8] sm:$0xff]  ;;  %v514_v39 = vpack.c.bf16 %v61_v35, %v60_v34  ;;  %v62_v40 = vld [vmem:[#allocation2 + $0x70] sm:$0xff]  ;;  %v155_v43 = vld [vmem:[#allocation2 + $0xe0] sm:$0xff] }
  0x2f   :  { %524 = vmatpush3.bf16.msra.mxu1 %v523_v18  ;;  %v63_v41 = vld [vmem:[#allocation2 + $0x78] sm:$0xff]  ;;  %v535_v42 = vpack.c.bf16 %v154_v38, %v153_v37  ;;  %v156_v44 = vld [vmem:[#allocation2 + $0xe8] sm:$0xff]  ;;  %v47_v47 = vld [vmem:[%s728_s0] sm:$0x3] }
  0x30   :  { %525 = vmatprep.subr.bf16.mxu1 %v626_v0  ;;  %v517_v45 = vpack.c.bf16 %v63_v41, %v62_v40  ;;  %v538_v46 = vpack.c.bf16 %v156_v44, %v155_v43  ;;  %v157_v48 = vld [vmem:[#allocation2 + $0xf0] sm:$0xff]  ;;  %v158_v49 = vld [vmem:[#allocation2 + $0xf8] sm:$0xff]  ;;  %v239_v51 = vld [vmem:[#allocation4] sm:$0xff] }
  0x31   :  { %503 = vmatpush3.bf16.msra.mxu0 %v502_v14  ;;  %v541_v50 = vpack.c.bf16 %v158_v49, %v157_v48  ;;  %v240_v52 = vld [vmem:[#allocation4 + $0x8] sm:$0xff]  ;;  %v241_v53 = vld [vmem:[#allocation4 + $0x10] sm:$0xff]  ;;  %v242_v55 = vld [vmem:[#allocation4 + $0x18] sm:$0xff] }
  0x32   :  { %504 = vmatprep.subr.bf16.mxu0 %v626_v0  ;;  %v544_v54 = vpack.c.bf16 %v240_v52, %v239_v51  ;;  %v547_v56 = vpack.c.bf16 %v242_v55, %v241_v53  ;;  %v243_v57 = vld [vmem:[#allocation4 + $0x20] sm:$0xff]  ;;  %v244_v58 = vld [vmem:[#allocation4 + $0x28] sm:$0xff]  ;;  %v245_v60 = vld [vmem:[#allocation4 + $0x30] sm:$0xff] }
  0x33   :  { %527 = vmatpush3.bf16.msra.mxu1 %v526_v24  ;;  %v550_v59 = vpack.c.bf16 %v244_v58, %v243_v57  ;;  %v246_v61 = vld [vmem:[#allocation4 + $0x38] sm:$0xff]  ;;  %v247_v63 = vld [vmem:[#allocation4 + $0x40] sm:$0xff]  ;;  %v249_v3 = vld [vmem:[#allocation4 + $0x50] sm:$0xff] }
  0x34   :  { %528 = vmatprep.subr.bf16.mxu1 %v626_v0  ;;  %v553_v62 = vpack.c.bf16 %v246_v61, %v245_v60  ;;  %v250_v4 = vld [vmem:[#allocation4 + $0x58] sm:$0xff]  ;;  %v251_v6 = vld [vmem:[#allocation4 + $0x60] sm:$0xff]  ;;  %v252_v7 = vld [vmem:[#allocation4 + $0x68] sm:$0xff] }
  0x35   :  { %506 = vmatpush3.bf16.msra.mxu0 %v505_v21  ;;  %v559_v5 = vpack.c.bf16 %v250_v4, %v249_v3  ;;  %v562_v8 = vpack.c.bf16 %v252_v7, %v251_v6  ;;  %v336_v9 = vld [vmem:[%s730_s2] ss:$0 sm:$0xff]  ;;  %v253_v14 = vld [vmem:[#allocation4 + $0x70] sm:$0xff]  ;;  %v254_v15 = vld [vmem:[#allocation4 + $0x78] sm:$0xff] }
  0x36   :  { %507 = vmatprep.subr.bf16.mxu0 %v626_v0  ;;  %v565_v16 = vpack.c.bf16 %v254_v15, %v253_v14  ;;  %v338_v17 = vld [vmem:[%s730_s2 + $0x1] ss:$0 sm:$0xff] }
  0x37   :  { %530 = vmatpush3.bf16.msra.mxu1 %v529_v30 }
  0x38   :  { %531 = vmatprep.subr.bf16.mxu1 %v626_v0 }
  0x39   :  { %509 = vmatpush3.bf16.msra.mxu0 %v508_v27 }
  0x3a   :  { %510 = vmatprep.subr.bf16.mxu0 %v626_v0 }
  0x3b   :  { %533 = vmatpush3.bf16.msra.mxu1 %v532_v36 }
  0x3c   :  { %534 = vmatprep.subr.bf16.mxu1 %v626_v0 }
  0x3d   :  { %512 = vmatpush3.bf16.msra.mxu0 %v511_v33 }
  0x3e   :  { %513 = vmatprep.subr.bf16.mxu0 %v626_v0 }
  0x3f   :  { %536 = vmatpush3.bf16.msra.mxu1 %v535_v42 }
  0x40   :  { %537 = vmatprep.subr.bf16.mxu1 %v626_v0 }
  0x41   :  { %515 = vmatpush3.bf16.msra.mxu0 %v514_v39 }
  0x42   :  { %516 = vmatprep.subr.bf16.mxu0 %v626_v0 }
  0x43   :  { %539 = vmatpush3.bf16.msra.mxu1 %v538_v46 }
  0x44   :  { %540 = vmatprep.subr.bf16.mxu1 %v626_v0 }
  0x45   :  { %518 = vmatpush3.bf16.msra.mxu0 %v517_v45 }
  0x46   :  { %543 = vmatprep.subr.bf16.mxu0 %v626_v0 }
  0x47   :  { %542 = vmatpush3.bf16.msra.mxu1 %v541_v50 }
  0x48   :  { %423 = vmatmul.mubr.f32.vlgmr.msra.gmra.mrb[0].mxu0 %v47_v47 }
  0x49   :  { %492 = vmatprep.mubr.msk.f32.mxu0 %vm627_vm0, %v628_v1  ;;  %545 = vmatpush3.bf16.msra.mxu0 %v544_v54  ;;  %v248_v1 = vld [vmem:[#allocation4 + $0x48] sm:$0xff] }
  0x4a   :  { %546 = vmatprep.subr.bf16.mxu0 %v626_v0  ;;  %v556_v2 = vpack.c.bf16 %v248_v1, %v247_v63 }
  0x4d   :  { %548 = vmatpush3.bf16.msra.mxu0 %v547_v56 }
  0x4e   :  { %549 = vmatprep.subr.bf16.mxu0 %v626_v0 }
  0x51   :  { %551 = vmatpush3.bf16.msra.mxu0 %v550_v59 }
  0x52   :  { %552 = vmatprep.subr.bf16.mxu0 %v626_v0 }
  0x55   :  { %554 = vmatpush3.bf16.msra.mxu0 %v553_v62 }
  0x56   :  { %555 = vmatprep.subr.bf16.mxu0 %v626_v0 }
  0x59   :  { %557 = vmatpush3.bf16.msra.mxu0 %v556_v2 }
  0x5a   :  { %558 = vmatprep.subr.bf16.mxu0 %v626_v0 }
  0x5d   :  { %560 = vmatpush3.bf16.msra.mxu0 %v559_v5 }
  0x5e   :  { %561 = vmatprep.subr.bf16.mxu0 %v626_v0 }
  0x61   :  { %563 = vmatpush3.bf16.msra.mxu0 %v562_v8 }
  0x62   :  { %564 = vmatprep.subr.bf16.mxu0 %v626_v0 }
  0x65   :  { %566 = vmatpush3.bf16.msra.mxu0 %v565_v16 }
 0x11b   :  { %v137_v10 = vpop.f32.mrb[0].mxu0 }
 0x11c   :  { %v138_v11 = vadd.f32 %v336_v9, %v137_v10  ;;  %v424_v12 = vpop.f32.mrb[1].mxu0 }
 0x11e   :  { %v141_v13 = vmax.f32 %v138_v11, 0.0 }
 0x120   :  { %458 = vmatmul.mubr.f32.vlgmr.msra.gmra.mrb[0].mxu1 %v141_v13 }
 0x1f3   :  { %v233_v18 = vpop.f32.mrb[0].mxu1 }
 0x1f4   :  { %v234_v19 = vadd.f32 %v338_v17, %v233_v18  ;;  %v459_v0 = vpop.f32.mrb[1].mxu1 }
 0x1f6   :  { %v237_v20 = vmax.f32 %v234_v19, 0.0 }
 0x1f8   :  { %238 = vst [vmem:[%s732_s4] sm:$0x3] %v237_v20  ;;  %493 = vmatmul.mubr.f32.vlgmr.msra.gmra.mrb[2].mxu0 %v237_v20 }
 0x2cb   :  { %v321_v21 = vpop.f32.mrb[2].mxu0 }
 0x2cc   :  { %325 = vst [vmem:[%s733_s5] sm:$0x3] %v321_v21  ;;  %v494_v22 = vpop.f32.mrb[3].mxu0 }
 0x2cd   :  { %334 = vsyncpa [#allocation3], 1 }
 0x2ce   :  { %335 = vsyncpa [#allocation5], 1 }

</bundles_post_ra>
